<compile_context>
chip_gen: v5e
topology: v5e:2x2
jax: 0.10.0
libtpu: 0.0.40
codegen_flags: <defaults>
</compile_context>

<pallas_src>
import functools

import jax
import jax.numpy as jnp
from jax.experimental import pallas as pl
from jax.experimental.pallas import tpu as pltpu

_MIB = 1024 * 1024


def _cdiv(a: int, b: int) -> int:
    return -(-a // b)


# ---------------------------------------------------------------------------
# Hardware-aware defaults (VMEM budget, scoped-VMEM limit, # TensorCores).
# ---------------------------------------------------------------------------
def _tpu_limits():
    """Returns (pipeline_budget_bytes, vmem_limit_bytes, num_tensorcores)."""
    vmem_capacity = 64 * _MIB  # conservative default = v7x per-TC VMEM
    try:
        info = pltpu.get_tpu_info()
        cap = getattr(info, "vmem_capacity_bytes", None)
        if cap:
            vmem_capacity = int(cap)
    except Exception:
        # Query unavailable (e.g. interpret mode) -> keep conservative default.
        pass
    if vmem_capacity <= 64 * _MIB:
        # v7x: 64 MiB VMEM per TensorCore, 2 TensorCores share the grid.
        return 40 * _MIB, 48 * _MIB, 2
    # v5e / v6e: 128 MiB physical VMEM, single TensorCore.  The default scoped
    # limit is only 16 / 32 MiB, so an explicit limit is still worthwhile.
    return 48 * _MIB, 64 * _MIB, 1


# ---------------------------------------------------------------------------
# Block sizing with (sublane, 128)-tile padded accounting.
# ---------------------------------------------------------------------------
def _sublane_tile(dtype) -> int:
    # f32 -> 8 sublanes per tile, bf16 -> 16, int8/fp8 -> 32.
    itemsize = jnp.dtype(dtype).itemsize
    return 8 * max(1, 4 // itemsize)


def _lane_padded(n: int) -> int:
    return _cdiv(n, 128) * 128


def _pick_rows_per_block(total_rows: int, lane_sizes, dtype, budget: int,
                         num_cores: int) -> int:
    """Rows per grid step for 2-D (rows, lanes) blocks.

    `lane_sizes` lists the lane widths of every block (inputs + outputs) that
    is double-buffered each step.  Footprints use the real (sublane, 128)
    tile-padded size, not raw bytes, so small W never overflows VMEM.
    """
    itemsize = jnp.dtype(dtype).itemsize
    sub = _sublane_tile(dtype)
    bytes_per_row_group = 2 * sub * sum(_lane_padded(l) for l in lane_sizes) * itemsize
    groups = max(1, budget // bytes_per_row_group)
    rows = min(total_rows, groups * sub)
    # v7x only: two TensorCores shard a "parallel" grid axis, so keep the step
    # count even (odd counts leave one core with up to 2x the work).  Skipped
    # on single-core v5e / v6e so blocks stay as large as possible.
    if num_cores >= 2 and total_rows >= 2 * sub:
        steps = _cdiv(total_rows, rows)
        if steps % 2 == 1:
            steps += 1
            rows = min(rows, _cdiv(_cdiv(total_rows, steps), sub) * sub)
            rows = max(rows, sub)
    return rows


# ---------------------------------------------------------------------------
# Circular LR pad (wrap along width).
# ---------------------------------------------------------------------------
def _lr_pad_kernel(x_ref, o_ref, *, padding: int, width: int):
    # x_ref: (R, W) block; o_ref: (R, W + 2*padding) block.
    # Build the whole padded block in vregs and issue ONE full-width store per
    # row (instead of three masked slice-stores).  The lane shifts needed to
    # assemble the wrap run on the XLU, which has slack in this store-bound
    # kernel; the vst count drops ~3x.
    x = x_ref[...]
    o_ref[...] = jnp.concatenate(
        [x[:, width - padding:], x, x[:, :padding]], axis=-1)


def lr_pad(x: jax.Array, padding: int = 1) -> jax.Array:
    """Equivalent of torch.cat([x[..., -p:], x, x[..., :p]], dim=3) for NCHW x."""
    assert x.ndim == 4, "expected NCHW input"
    N, C, H, W = x.shape
    assert 0 < padding <= W
    Wo = W + 2 * padding
    rows = N * C * H

    budget, vmem_limit, num_cores = _tpu_limits()
    R = _pick_rows_per_block(rows, (W, Wo), x.dtype, budget, num_cores)

    x2 = x.reshape(rows, W)
    out = pl.pallas_call(
        functools.partial(_lr_pad_kernel, padding=padding, width=W),
        out_shape=jax.ShapeDtypeStruct((rows, Wo), x.dtype),
        grid_spec=pltpu.PrefetchScalarGridSpec(
            num_scalar_prefetch=0,
            grid=(_cdiv(rows, R),),
            # Minor block dims equal the full array dims (W / Wo), so the
            # (8,128) rule is satisfied for any width; the sublane-aligned
            # row dimension carries the tiling.
            in_specs=[pl.BlockSpec((R, W), lambda i: (i, 0))],
            out_specs=pl.BlockSpec((R, Wo), lambda i: (i, 0)),
        ),
        compiler_params=pltpu.CompilerParams(
            dimension_semantics=("parallel",),
            vmem_limit_bytes=vmem_limit,
        ),
    )(x2)
    return out.reshape(N, C, H, Wo)


def lr_pad_reference(x: jax.Array, padding: int = 1) -> jax.Array:
    return jnp.concatenate([x[..., -padding:], x, x[..., :padding]], axis=3)


# ---------------------------------------------------------------------------
# Final ReLU (Densenet.final_relu) — lane-dense flattened layout.
# ---------------------------------------------------------------------------
def _relu_kernel(x_ref, o_ref):
    o_ref[...] = jnp.maximum(x_ref[...], 0).astype(o_ref.dtype)


def final_relu(x: jax.Array) -> jax.Array:
    """ReLU over an NCHW feature map (Densenet.final_relu)."""
    orig_shape = x.shape
    total = x.size
    # Lane-dense flattening: (rows, L) with L a multiple of 128 gives unmasked
    # full-vreg loads/stores and >= 512 B HBM DMA runs, instead of putting the
    # small W dim (7..224 for densenet169 maps) on the lane axis.
    lane = next((l for l in (1024, 512, 256, 128) if total % l == 0), None)
    if lane is None:
        lane = orig_shape[-1]  # rare fallback: keep the trailing dim on lanes
    rows = total // lane

    budget, vmem_limit, num_cores = _tpu_limits()
    R = _pick_rows_per_block(rows, (lane, lane), x.dtype, budget, num_cores)

    x2 = x.reshape(rows, lane)
    out = pl.pallas_call(
        _relu_kernel,
        out_shape=jax.ShapeDtypeStruct((rows, lane), x.dtype),
        grid_spec=pltpu.PrefetchScalarGridSpec(
            num_scalar_prefetch=0,
            grid=(_cdiv(rows, R),),
            in_specs=[pl.BlockSpec((R, lane), lambda i: (i, 0))],
            out_specs=pl.BlockSpec((R, lane), lambda i: (i, 0)),
        ),
        compiler_params=pltpu.CompilerParams(
            dimension_semantics=("parallel",),
            vmem_limit_bytes=vmem_limit,
        ),
    )(x2)
    return out.reshape(orig_shape)


if __name__ == "__main__":
    key = jax.random.PRNGKey(0)
    k1, k2, k3, k4 = jax.random.split(key, 4)

    # --- lr_pad: main smoke shape (NCHW, consistent with the module) ---
    x = jax.random.normal(k1, (2, 4, 16, 16), dtype=jnp.float32)
    out = jax.block_until_ready(lr_pad(x, padding=1))
    ref = lr_pad_reference(x, padding=1)
    assert out.shape == (2, 4, 16, 18), out.shape
    assert out.dtype == x.dtype
    assert jnp.array_equal(out, ref), "lr_pad mismatch vs reference"

    # --- lr_pad: rows not divisible by the block (remainder block, clipped) ---
    x2 = jax.random.normal(k2, (1, 7, 8, 32), dtype=jnp.float32)
    out2 = jax.block_until_ready(lr_pad(x2, padding=2))
    assert out2.shape == (1, 7, 8, 36), out2.shape
    assert jnp.array_equal(out2, lr_pad_reference(x2, padding=2)), \
        "lr_pad (remainder) mismatch"

    # --- final ReLU: lane-dense flattened path ---
    f = jax.random.normal(k3, (2, 4, 16, 16), dtype=jnp.float32)
    r = jax.block_until_ready(final_relu(f))
    assert r.shape == f.shape and r.dtype == f.dtype
    assert jnp.array_equal(r, jnp.maximum(f, 0.0)), "final_relu mismatch"

    # --- final ReLU: fallback path (no 128-multiple divisor of total size) ---
    g = jax.random.normal(k4, (1, 3, 5, 7), dtype=jnp.float32)
    rg = jax.block_until_ready(final_relu(g))
    assert jnp.array_equal(rg, jnp.maximum(g, 0.0)), "final_relu (fallback) mismatch"

    print("KERNEL_OK")
</pallas_src>

<mosaic_0001>
module attributes {stable_mosaic.version = 11 : i64} {
  func.func @_lr_pad_kernel(%arg0: i32, %arg1: memref<64x16xf32, #tpu.memory_space<vmem>>, %arg2: memref<64x18xf32, #tpu.memory_space<vmem>>) attributes {dimension_semantics = [#tpu.dimension_semantics<parallel>], iteration_bounds = array<i64: 2>, scalar_prefetch = 0 : i64, scratch_operands = 0 : i64, tpu.core_type = #tpu.core_type<tc>, window_params = [{transform_indices = @transform_0, window_bounds = array<i64: 64, 16>}, {transform_indices = @transform_1, window_bounds = array<i64: 64, 18>}]} {
    %c0 = arith.constant 0 : index
    %c0_0 = arith.constant 0 : index
    %0 = vector.load %arg1[%c0, %c0_0] : memref<64x16xf32, #tpu.memory_space<vmem>>, vector<64x16xf32>
    %1 = vector.extract_strided_slice %0 {offsets = [0, 15], sizes = [64, 1], strides = [1, 1]} : vector<64x16xf32> to vector<64x1xf32>
    %2 = vector.extract_strided_slice %0 {offsets = [0, 0], sizes = [64, 1], strides = [1, 1]} : vector<64x16xf32> to vector<64x1xf32>
    %3 = tpu.concatenate %1, %0, %2 in 1 : vector<64x1xf32>, vector<64x16xf32>, vector<64x1xf32> -> vector<64x18xf32>
    %c0_1 = arith.constant 0 : index
    %c0_2 = arith.constant 0 : index
    %4 = vector.load %arg2[%c0_1, %c0_2] : memref<64x18xf32, #tpu.memory_space<vmem>>, vector<64x18xf32>
    tpu.vector_store %arg2[%c0_1, %c0_2], %3 {strides = array<i32>} : memref<64x18xf32, #tpu.memory_space<vmem>>, vector<64x18xf32>,
    return
  }
  func.func @transform_0(%arg0: i32) -> (i32, i32) {
    %c0_i32 = arith.constant 0 : i32
    %c0_i32_0 = arith.constant 0 : i32
    return %arg0, %c0_i32 : i32, i32
  }
  func.func @transform_1(%arg0: i32) -> (i32, i32) {
    %c0_i32 = arith.constant 0 : i32
    %c0_i32_0 = arith.constant 0 : i32
    return %arg0, %c0_i32 : i32, i32
  }
}

</mosaic_0001>

<bundles_post_ra>
// kernel: tpu_custom_call.1
= control target key start
LH: loop header
LB: loop body
LE: loop exit
PB: predicated region body
PF: predicated region fallthrough
CT: control target
= control target key end

     0   :  { %s334_s6 = smov 0   ;;  %s392_s0 = inlined_call_operand.vmem [shape: f32[128,16], index: 0, kind: input, shape index: {}]   ;;  %s393_s1 = inlined_call_operand.vmem [shape: f32[128,18], index: 1, kind: output, shape index: {}]  }
   0x1 LB: > { %s291_s7 = sadd.s32 4294967295, %s319_s6   ;;  %p295_p0 = scmp.ge.s32.totalorder %s319_s6, 1  ;;  %s319_s6 = sphi %s334_s6, %s11_s6  }
   0x2   : > { %p88_p1 = scmp.lt.s32.totalorder %s319_s6, 3 }
   0x4   : > { %p89_p2 = pnand %p295_p0, %p88_p1 }
   0x5   : > { %s296_s8 = sshll.u32 (!%p89_p2), %s291_s7, 3  ;;  %s321_s13 = smov (!%p89_p2), 113  }
   0x6   : > { %92 = sbr.rel (%p89_p2) target bundleno = 189 (0xbd), region = 24  ;;  %p109_p3 = scmp.lt.s32.totalorder (!%p89_p2), %s296_s8, 15 }
   0x7   : > { %s322_s14 = smov (!%p89_p2), 1   ;;  %s323_s15 = smov (!%p89_p2), 17  }
   0xb   : > { %s395_s8 = smov (!%p109_p3, %s296_s8), 15  ;;  %vm217_vm0 = vcmask 138240   ;;  %vm208_vm1 = vcmask 7168   ;;  %vm226_vm2 = vcmask 146432  }
   0xc   : > { %s297_s9 = sshll.u32 %s395_s8, 3 }
   0xd   : > { %s112_s12 = scalar_lea.vmem %s392_s0, %s297_s9  ;;  %s355_s18 = scalar_lea.vmem %s393_s1, %s297_s9 }
   0xe   : > { %v122_v0 = vld [vmem:[%s112_s12 + $0x10] sm:$0xff]  ;;  %v120_v1 = vld [vmem:[%s112_s12] sm:$0xff]  ;;  %v123_v3 = vld [vmem:[%s112_s12 + $0x18] sm:$0xff] }
   0xf   : > { %v124_v2 = vld [vmem:[%s112_s12 + $0x20] sm:$0xff]  ;;  %140 = vrot.lane.b32.xlu1 %v122_v0, %s321_s13  ;;  %136 = vrot.lane.b32.xlu0 %v120_v1, %s321_s13  ;;  %v121_v4 = vld [vmem:[%s112_s12 + $0x8] sm:$0xff] }
  0x10   : > { %144 = vrot.lane.b32.xlu2 %v124_v2, %s321_s13  ;;  %v125_v5 = vld [vmem:[%s112_s12 + $0x28] sm:$0xff]  ;;  %v127_v6 = vld [vmem:[%s112_s12 + $0x38] sm:$0xff]  ;;  %v126_v7 = vld [vmem:[%s112_s12 + $0x30] sm:$0xff] }
  0x17   : > { %142 = vrot.lane.b32.xlu1 %v123_v3, %s321_s13  ;;  %138 = vrot.lane.b32.xlu0 %v121_v4, %s321_s13 }
  0x18   : > { %146 = vrot.lane.b32.xlu2 %v125_v5, %s321_s13 }
  0x1f   : > { %150 = vrot.lane.b32.xlu1 %v127_v6, %s321_s13  ;;  %148 = vrot.lane.b32.xlu0 %v126_v7, %s321_s13 }
  0x20   : > { %160 = vrot.lane.b32.xlu2 %v120_v1, %s322_s14 }
  0x27   : > { %164 = vrot.lane.b32.xlu1 %v122_v0, %s322_s14  ;;  %162 = vrot.lane.b32.xlu0 %v121_v4, %s322_s14 }
  0x28   : > { %166 = vrot.lane.b32.xlu2 %v123_v3, %s322_s14 }
  0x2f   : > { %170 = vrot.lane.b32.xlu1 %v125_v5, %s322_s14  ;;  %168 = vrot.lane.b32.xlu0 %v124_v2, %s322_s14 }
  0x30   : > { %172 = vrot.lane.b32.xlu2 %v126_v7, %s322_s14 }
  0x37   : > { %184 = vrot.lane.b32.xlu1 %v120_v1, %s323_s15  ;;  %174 = vrot.lane.b32.xlu0 %v127_v6, %s322_s14 }
  0x38   : > { %186 = vrot.lane.b32.xlu2 %v121_v4, %s323_s15 }
  0x3f   : > { %190 = vrot.lane.b32.xlu1 %v123_v3, %s323_s15  ;;  %188 = vrot.lane.b32.xlu0 %v122_v0, %s323_s15 }
  0x40   : > { %192 = vrot.lane.b32.xlu2 %v124_v2, %s323_s15 }
  0x47   : > { %196 = vrot.lane.b32.xlu1 %v126_v7, %s323_s15  ;;  %194 = vrot.lane.b32.xlu0 %v125_v5, %s323_s15 }
  0x48   : > { %198 = vrot.lane.b32.xlu2 %v127_v6, %s323_s15 }
  0x6a   : > { %v145_v8 = vpop.permute.xlu2 %144 }
  0x72   : > { %v147_v9 = vpop.permute.xlu2 %146 }
  0x7a   : > { %v161_v10 = vpop.permute.xlu2 %160 }
  0x81   : > { %v141_v11 = vpop.permute.xlu1 %140  ;;  %v137_v12 = vpop.permute.xlu0 %136 }
  0x82   : > { %v167_v13 = vpop.permute.xlu2 %166  ;;  %v209_v30 = vsel %vm208_vm1, %v137_v12, %v161_v10 }
  0x89   : > { %v143_v14 = vpop.permute.xlu1 %142  ;;  %v139_v15 = vpop.permute.xlu0 %138 }
  0x8a   : > { %v173_v16 = vpop.permute.xlu2 %172  ;;  %v212_v36 = vsel %vm208_vm1, %v143_v14, %v167_v13 }
  0x91   : > { %v151_v17 = vpop.permute.xlu1 %150  ;;  %v149_v18 = vpop.permute.xlu0 %148 }
  0x92   : > { %v187_v19 = vpop.permute.xlu2 %186  ;;  %v215_v42 = vsel %vm208_vm1, %v149_v18, %v173_v16 }
  0x99   : > { %v165_v20 = vpop.permute.xlu1 %164  ;;  %v163_v21 = vpop.permute.xlu0 %162 }
  0x9a   : > { %v210_v22 = vsel %vm208_vm1, %v139_v15, %v163_v21  ;;  %v193_v24 = vpop.permute.xlu2 %192  ;;  %v211_v37 = vsel %vm208_vm1, %v141_v11, %v165_v20 }
  0x9b   : > { %v219_v23 = vsel %vm217_vm0, %v210_v22, %v187_v19 }
  0x9c   : > { %228 = vst.msk [vmem:[%s355_s18 + $0x8] sm:$0xff] %vm226_vm2, %v219_v23 }
  0xa1   : > { %v171_v25 = vpop.permute.xlu1 %170  ;;  %v169_v26 = vpop.permute.xlu0 %168 }
  0xa2   : > { %v213_v27 = vsel %vm208_vm1, %v145_v8, %v169_v26  ;;  %v199_v29 = vpop.permute.xlu2 %198  ;;  %v214_v43 = vsel %vm208_vm1, %v147_v9, %v171_v25 }
  0xa3   : > { %v222_v28 = vsel %vm217_vm0, %v213_v27, %v193_v24 }
  0xa4   : > { %231 = vst.msk [vmem:[%s355_s18 + $0x20] sm:$0xff] %vm226_vm2, %v222_v28 }
  0xa9   : > { %v185_v31 = vpop.permute.xlu1 %184  ;;  %v175_v32 = vpop.permute.xlu0 %174 }
  0xaa   : > { %v218_v33 = vsel %vm217_vm0, %v209_v30, %v185_v31  ;;  %v216_v34 = vsel %vm208_vm1, %v151_v17, %v175_v32 }
  0xab   : > { %227 = vst.msk [vmem:[%s355_s18] sm:$0xff] %vm226_vm2, %v218_v33  ;;  %v225_v35 = vsel %vm217_vm0, %v216_v34, %v199_v29 }
  0xac   : > { %234 = vst.msk [vmem:[%s355_s18 + $0x38] sm:$0xff] %vm226_vm2, %v225_v35 }
  0xb1   : > { %v191_v38 = vpop.permute.xlu1 %190  ;;  %v189_v39 = vpop.permute.xlu0 %188 }
  0xb2   : > { %v221_v40 = vsel %vm217_vm0, %v212_v36, %v191_v38  ;;  %v220_v41 = vsel %vm217_vm0, %v211_v37, %v189_v39 }
  0xb3   : > { %230 = vst.msk [vmem:[%s355_s18 + $0x18] sm:$0xff] %vm226_vm2, %v221_v40 }
  0xb4   : > { %229 = vst.msk [vmem:[%s355_s18 + $0x10] sm:$0xff] %vm226_vm2, %v220_v41 }
  0xb9   : > { %v197_v44 = vpop.permute.xlu1 %196  ;;  %v195_v45 = vpop.permute.xlu0 %194 }
  0xba   : > { %v224_v46 = vsel %vm217_vm0, %v215_v42, %v197_v44  ;;  %v223_v47 = vsel %vm217_vm0, %v214_v43, %v195_v45 }
  0xbb   : > { %233 = vst.msk [vmem:[%s355_s18 + $0x30] sm:$0xff] %vm226_vm2, %v224_v46 }
  0xbc   : > { %232 = vst.msk [vmem:[%s355_s18 + $0x28] sm:$0xff] %vm226_vm2, %v223_v47 }
  0xbd PF: > { %s11_s6 = sadd.s32 1, %s319_s6  }
  0xbe   : > { %p8_p4 = scmp.ge.s32.totalorder %s11_s6, 4  }
  0xc0   :  { %10 = sbr.rel (!%p8_p4) target bundleno = 1 (0x1), region = 54 }

</bundles_post_ra>
